<compile_context>
chip_gen: v7x
topology: tpu7x:2x2x1
jax: 0.10.0
libtpu: 0.0.40
codegen_flags: <defaults>
</compile_context>

<pallas_src>
import functools

import jax
import jax.numpy as jnp
from jax.experimental import pallas as pl
from jax.experimental.pallas import tpu as pltpu

LANES = 128
ROW_ALIGN = 32                         # lcm of sublane packing for 8/16/32-bit dtypes
MAX_BLOCK_ROWS = 8192                  # caps per-block element count (bounds VMEM temps)
VMEM_INPUT_BUDGET = 8 * 1024 * 1024    # bytes for double-buffered input blocks


def _canonicalize(x):
    """Keep inputs narrow so the kernel streams the minimum number of HBM bytes."""
    x = jnp.asarray(x)
    dt = x.dtype
    if dt == jnp.bool_:
        return x.astype(jnp.uint8)
    if jnp.issubdtype(dt, jnp.floating):
        if dt == jnp.float32 or dt == jnp.bfloat16:
            return x
        return x.astype(jnp.float32)                       # f16 / f64 -> f32
    if dt.itemsize > 4:                                     # int64/uint64 (x64 mode only)
        if jnp.issubdtype(dt, jnp.unsignedinteger):
            x = jnp.minimum(x, jnp.asarray(2, dt))
        else:
            x = jnp.clip(x, jnp.asarray(-2, dt), jnp.asarray(2, dt))
        return x.astype(jnp.int32)                          # clip first: no wrap into [0,1]
    return x                                                # int8/uint8/16/32 stay native


def _core_split():
    """Leading-grid-axis size + semantics.  Only v7x-class chips have 2 TCs per
    chip; on 1-TC chips a core axis would just re-stream duplicate blocks."""
    try:
        dev = jax.devices()[0]
        if dev.platform != "tpu":
            return 1, "arbitrary"
        kind = str(getattr(dev, "device_kind", "")).lower()
    except Exception:
        return 1, "arbitrary"
    if "v7" in kind or "7x" in kind:
        return 2, getattr(pltpu, "CORE_PARALLEL", "parallel")
    return 1, "arbitrary"


@functools.partial(jax.jit, static_argnames=("row_tile",))
def jaccard_index_pallas(mask_gt, mask_pred, row_tile=None):
    """Scalar miou[0], exactly as the PyTorch module's forward()."""
    gt = _canonicalize(mask_gt).reshape(-1)
    pred = _canonicalize(mask_pred).reshape(-1)
    n = gt.shape[0]
    if n == 0:
        return jnp.asarray(jnp.nan, jnp.float32)

    # Lay the flat stream out as (rows, 128) lanes.  Only a <128-element tail is
    # ever padded (value 2 lies outside the [0, 1] bin); for n % 128 == 0 this is
    # a no-op, so the common case has zero extra HBM passes.
    pad = (-n) % LANES
    if pad:
        gt = jnp.pad(gt, (0, pad), constant_values=2)
        pred = jnp.pad(pred, (0, pad), constant_values=2)
    rows = (n + pad) // LANES
    gt2 = gt.reshape(rows, LANES)
    pred2 = pred.reshape(rows, LANES)

    # Row tile: biggest block that keeps 2 inputs x 2 pipeline buffers inside the
    # VMEM budget (~2 MiB/block for int32, ~1 MiB/block for uint8).
    bytes_per_row = LANES * (gt2.dtype.itemsize + pred2.dtype.itemsize)
    rt = VMEM_INPUT_BUDGET // (2 * bytes_per_row) if row_tile is None else int(row_tile)
    rt = max(ROW_ALIGN, min((rt // ROW_ALIGN) * ROW_ALIGN, MAX_BLOCK_ROWS))
    if rows <= rt:
        rt = rows                       # single full-extent block (always legal)
    total_blocks = pl.cdiv(rows, rt)

    num_cores, core_sem = _core_split()
    num_cores = min(num_cores, total_blocks)
    if num_cores < 2:
        core_sem = "arbitrary"
    bpc = pl.cdiv(total_blocks, num_cores)   # row-blocks per core

    def idx_map(c, i):
        # A core that runs out of real blocks re-reads the last block; the
        # in-kernel row mask zeroes its contribution.
        return (jnp.minimum(c * bpc + i, total_blocks - 1), 0)

    def in_bin(x):
        if jnp.issubdtype(x.dtype, jnp.unsignedinteger):
            return x <= 1               # x >= 0 is vacuous for unsigned
        return (x >= 0) & (x <= 1)

    def kernel(gt_ref, pred_ref, out_ref):
        c = pl.program_id(0)
        i = pl.program_id(1)

        @pl.when(i == 0)
        def _init():
            out_ref[...] = jnp.zeros_like(out_ref)

        gt_blk = gt_ref[...]            # (rt, 128), native dtype
        pred_blk = pred_ref[...]        # (rt, 128), native dtype

        pred_in = in_bin(pred_blk)
        gt_in = in_bin(gt_blk)
        inter = (pred_blk == gt_blk) & pred_in   # equality + in-bin (gt then too)

        def accumulate(m_inter, m_pred, m_gt):
            # Per-lane int32 partials; the tiny cross-lane reduce is in the epilogue.
            out_ref[0, 0] += jnp.sum(m_inter.astype(jnp.int32), axis=0, keepdims=True)
            out_ref[0, 1] += jnp.sum(m_pred.astype(jnp.int32), axis=0, keepdims=True)
            out_ref[0, 2] += jnp.sum(m_gt.astype(jnp.int32), axis=0, keepdims=True)

        row0 = (c * bpc + i) * rt       # logical (unclamped) first row of this block

        @pl.when(row0 + rt <= rows)     # fast path: every row of the block is valid
        def _full():
            accumulate(inter, pred_in, gt_in)

        @pl.when(row0 + rt > rows)      # partial last block / clamped duplicate block
        def _masked():
            row_idx = row0 + jax.lax.broadcasted_iota(jnp.int32, (rt, LANES), 0)
            valid = row_idx < rows
            accumulate(inter & valid, pred_in & valid, gt_in & valid)

    parts = pl.pallas_call(
        kernel,
        out_shape=jax.ShapeDtypeStruct((num_cores, 3, 1, LANES), jnp.int32),
        grid_spec=pltpu.PrefetchScalarGridSpec(
            num_scalar_prefetch=0,
            grid=(num_cores, bpc),
            in_specs=[
                pl.BlockSpec((rt, LANES), idx_map),
                pl.BlockSpec((rt, LANES), idx_map),
            ],
            out_specs=pl.BlockSpec((1, 3, 1, LANES), lambda c, i: (c, 0, 0, 0)),
        ),
        compiler_params=pltpu.CompilerParams(
            dimension_semantics=(core_sem, "arbitrary"),
            vmem_limit_bytes=64 * 1024 * 1024,
        ),
    )(gt2, pred2)

    totals = jnp.sum(parts, axis=(0, 2, 3)).astype(jnp.float32)   # (3,) exact counts
    area_intersect = totals[0]
    area_pred = totals[1]
    area_label = totals[2]
    area_union = area_pred + area_label - area_intersect
    return area_intersect / area_union


def _reference_miou(mask_gt, mask_pred):
    """Pure-JAX reference matching the numpy/np.histogram semantics."""
    gt = jnp.asarray(mask_gt, jnp.float32).reshape(-1)
    pred = jnp.asarray(mask_pred, jnp.float32).reshape(-1)
    pred_in = (pred >= 0.0) & (pred <= 1.0)
    gt_in = (gt >= 0.0) & (gt <= 1.0)
    inter = jnp.sum(jnp.where((pred == gt) & pred_in, 1.0, 0.0))
    a_pred = jnp.sum(jnp.where(pred_in, 1.0, 0.0))
    a_gt = jnp.sum(jnp.where(gt_in, 1.0, 0.0))
    return inter / (a_pred + a_gt - inter)


if __name__ == "__main__":
    key = jax.random.PRNGKey(0)
    k1, k2, k3, k4, k5, k6, k7, k8 = jax.random.split(key, 8)

    def check(gt, pred, **kw):
        got = jax.block_until_ready(jaccard_index_pallas(gt, pred, **kw))
        ref = _reference_miou(gt, pred)
        assert jnp.allclose(got, ref, rtol=1e-6, atol=1e-6), (got, ref)

    # 1) Small binary segmentation maps: batch=2, spatial=16x16, int32 in {0, 1}.
    check(jax.random.randint(k1, (2, 16, 16), 0, 2, dtype=jnp.int32),
          jax.random.randint(k2, (2, 16, 16), 0, 2, dtype=jnp.int32))

    # 2) Larger int32 maps with out-of-bin values: multi-block grid + partial
    #    last block at the auto (large) tile size.
    check(jax.random.randint(k3, (1025, 1024), 0, 3, dtype=jnp.int32),
          jax.random.randint(k4, (1025, 1024), 0, 3, dtype=jnp.int32))

    # 3) Native uint8 masks, ragged length (tail-pad path), forced small tile
    #    -> multi-block + masked partial block, unsigned fast in-bin test.
    check(jax.random.randint(k5, (3, 50, 129), 0, 3, dtype=jnp.int32).astype(jnp.uint8),
          jax.random.randint(k6, (3, 50, 129), 0, 3, dtype=jnp.int32).astype(jnp.uint8),
          row_tile=64)

    # 4) Float maps with fractional in-bin values.
    vals = jnp.array([0.0, 0.5, 1.0, 2.0], jnp.float32)
    check(vals[jax.random.randint(k7, (7, 33), 0, 4)],
          vals[jax.random.randint(k8, (7, 33), 0, 4)])

    print("KERNEL_OK")
</pallas_src>

<mosaic_0001>
module attributes {stable_mosaic.version = 11 : i64} {
  func.func @kernel(%arg0: i32, %arg1: i32, %arg2: memref<4x128xi32, #tpu.memory_space<vmem>>, %arg3: memref<4x128xi32, #tpu.memory_space<vmem>>, %arg4: memref<1x3x1x128xi32, #tpu.memory_space<vmem>>) attributes {dimension_semantics = [#tpu.dimension_semantics<arbitrary>, #tpu.dimension_semantics<arbitrary>], iteration_bounds = array<i64: 1, 1>, scalar_prefetch = 0 : i64, scratch_operands = 0 : i64, tpu.core_type = #tpu.core_type<tc>, window_params = [{transform_indices = @transform_0, window_bounds = array<i64: 4, 128>}, {transform_indices = @transform_1, window_bounds = array<i64: 4, 128>}, {transform_indices = @transform_2, window_bounds = array<i64: 1, 3, 1, 128>}]} {
    %c0_i32 = arith.constant 0 : i32
    %0 = arith.cmpi eq, %arg1, %c0_i32 : i32
    %1 = arith.extui %0 : i1 to i32
    %c0_i32_0 = arith.constant 0 : i32
    %2 = arith.cmpi ne, %1, %c0_i32_0 : i32
    scf.if %2 {
      %c0_i32_14 = arith.constant 0 : i32
      %28 = vector.broadcast %c0_i32_14 : i32 to vector<1x3x1x128xi32>
      %c0_15 = arith.constant 0 : index
      %c0_16 = arith.constant 0 : index
      %c0_17 = arith.constant 0 : index
      %c0_18 = arith.constant 0 : index
      %29 = vector.load %arg4[%c0_15, %c0_16, %c0_17, %c0_18] : memref<1x3x1x128xi32, #tpu.memory_space<vmem>>, vector<1x3x1x128xi32>
      tpu.vector_store %arg4[%c0_15, %c0_16, %c0_17, %c0_18], %28 {strides = array<i32>} : memref<1x3x1x128xi32, #tpu.memory_space<vmem>>, vector<1x3x1x128xi32>,
    } else {
    }
    %c0 = arith.constant 0 : index
    %c0_1 = arith.constant 0 : index
    %3 = vector.load %arg2[%c0, %c0_1] : memref<4x128xi32, #tpu.memory_space<vmem>>, vector<4x128xi32>
    %c0_2 = arith.constant 0 : index
    %c0_3 = arith.constant 0 : index
    %4 = vector.load %arg3[%c0_2, %c0_3] : memref<4x128xi32, #tpu.memory_space<vmem>>, vector<4x128xi32>
    %c0_i32_4 = arith.constant 0 : i32
    %5 = vector.broadcast %c0_i32_4 : i32 to vector<4x128xi32>
    %6 = arith.cmpi sge, %4, %5 : vector<4x128xi32>
    %c1_i32 = arith.constant 1 : i32
    %7 = vector.broadcast %c1_i32 : i32 to vector<4x128xi32>
    %8 = arith.cmpi sle, %4, %7 : vector<4x128xi32>
    %9 = arith.andi %6, %8 : vector<4x128xi1>
    %c0_i32_5 = arith.constant 0 : i32
    %10 = vector.broadcast %c0_i32_5 : i32 to vector<4x128xi32>
    %11 = arith.cmpi sge, %3, %10 : vector<4x128xi32>
    %c1_i32_6 = arith.constant 1 : i32
    %12 = vector.broadcast %c1_i32_6 : i32 to vector<4x128xi32>
    %13 = arith.cmpi sle, %3, %12 : vector<4x128xi32>
    %14 = arith.andi %11, %13 : vector<4x128xi1>
    %15 = arith.cmpi eq, %4, %3 : vector<4x128xi32>
    %16 = arith.andi %15, %9 : vector<4x128xi1>
    %c1_i32_7 = arith.constant 1 : i32
    %17 = arith.muli %arg0, %c1_i32_7 : i32
    %18 = arith.addi %17, %arg1 : i32
    %c4_i32 = arith.constant 4 : i32
    %19 = arith.muli %18, %c4_i32 : i32
    %c4_i32_8 = arith.constant 4 : i32
    %20 = arith.addi %19, %c4_i32_8 : i32
    %c4_i32_9 = arith.constant 4 : i32
    %21 = arith.cmpi sle, %20, %c4_i32_9 : i32
    %22 = arith.extui %21 : i1 to i32
    %c0_i32_10 = arith.constant 0 : i32
    %23 = arith.cmpi ne, %22, %c0_i32_10 : i32
    scf.if %23 {
      %c0_14 = arith.constant 0 : index
      %c0_15 = arith.constant 0 : index
      %c0_16 = arith.constant 0 : index
      %c0_17 = arith.constant 0 : index
      %28 = vector.load %arg4[%c0_14, %c0_15, %c0_16, %c0_17] : memref<1x3x1x128xi32, #tpu.memory_space<vmem>>, vector<1x1x1x128xi32>
      %29 = vector.shape_cast %28 : vector<1x1x1x128xi32> to vector<1x128xi32>
      %30 = arith.extui %16 : vector<4x128xi1> to vector<4x128xi32>
      %cst = arith.constant dense<0> : vector<128xi32>
      %31 = vector.multi_reduction <add>, %30, %cst [0] : vector<4x128xi32> to vector<128xi32>
      %32 = vector.shape_cast %31 : vector<128xi32> to vector<1x128xi32>
      %33 = arith.addi %29, %32 : vector<1x128xi32>
      %c0_18 = arith.constant 0 : index
      %c0_19 = arith.constant 0 : index
      %c0_20 = arith.constant 0 : index
      %c0_21 = arith.constant 0 : index
      %34 = vector.load %arg4[%c0_18, %c0_19, %c0_20, %c0_21] : memref<1x3x1x128xi32, #tpu.memory_space<vmem>>, vector<1x1x1x128xi32>
      %35 = vector.shape_cast %34 : vector<1x1x1x128xi32> to vector<1x128xi32>
      %36 = vector.shape_cast %33 : vector<1x128xi32> to vector<1x1x1x128xi32>
      tpu.vector_store %arg4[%c0_18, %c0_19, %c0_20, %c0_21], %36 {strides = array<i32>} : memref<1x3x1x128xi32, #tpu.memory_space<vmem>>, vector<1x1x1x128xi32>,
      %c0_22 = arith.constant 0 : index
      %c1 = arith.constant 1 : index
      %c0_23 = arith.constant 0 : index
      %c0_24 = arith.constant 0 : index
      %37 = vector.load %arg4[%c0_22, %c1, %c0_23, %c0_24] : memref<1x3x1x128xi32, #tpu.memory_space<vmem>>, vector<1x1x1x128xi32>
      %38 = vector.shape_cast %37 : vector<1x1x1x128xi32> to vector<1x128xi32>
      %39 = arith.extui %9 : vector<4x128xi1> to vector<4x128xi32>
      %cst_25 = arith.constant dense<0> : vector<128xi32>
      %40 = vector.multi_reduction <add>, %39, %cst_25 [0] : vector<4x128xi32> to vector<128xi32>
      %41 = vector.shape_cast %40 : vector<128xi32> to vector<1x128xi32>
      %42 = arith.addi %38, %41 : vector<1x128xi32>
      %c0_26 = arith.constant 0 : index
      %c1_27 = arith.constant 1 : index
      %c0_28 = arith.constant 0 : index
      %c0_29 = arith.constant 0 : index
      %43 = vector.load %arg4[%c0_26, %c1_27, %c0_28, %c0_29] : memref<1x3x1x128xi32, #tpu.memory_space<vmem>>, vector<1x1x1x128xi32>
      %44 = vector.shape_cast %43 : vector<1x1x1x128xi32> to vector<1x128xi32>
      %45 = vector.shape_cast %42 : vector<1x128xi32> to vector<1x1x1x128xi32>
      tpu.vector_store %arg4[%c0_26, %c1_27, %c0_28, %c0_29], %45 {strides = array<i32>} : memref<1x3x1x128xi32, #tpu.memory_space<vmem>>, vector<1x1x1x128xi32>,
      %c0_30 = arith.constant 0 : index
      %c2 = arith.constant 2 : index
      %c0_31 = arith.constant 0 : index
      %c0_32 = arith.constant 0 : index
      %46 = vector.load %arg4[%c0_30, %c2, %c0_31, %c0_32] : memref<1x3x1x128xi32, #tpu.memory_space<vmem>>, vector<1x1x1x128xi32>
      %47 = vector.shape_cast %46 : vector<1x1x1x128xi32> to vector<1x128xi32>
      %48 = arith.extui %14 : vector<4x128xi1> to vector<4x128xi32>
      %cst_33 = arith.constant dense<0> : vector<128xi32>
      %49 = vector.multi_reduction <add>, %48, %cst_33 [0] : vector<4x128xi32> to vector<128xi32>
      %50 = vector.shape_cast %49 : vector<128xi32> to vector<1x128xi32>
      %51 = arith.addi %47, %50 : vector<1x128xi32>
      %c0_34 = arith.constant 0 : index
      %c2_35 = arith.constant 2 : index
      %c0_36 = arith.constant 0 : index
      %c0_37 = arith.constant 0 : index
      %52 = vector.load %arg4[%c0_34, %c2_35, %c0_36, %c0_37] : memref<1x3x1x128xi32, #tpu.memory_space<vmem>>, vector<1x1x1x128xi32>
      %53 = vector.shape_cast %52 : vector<1x1x1x128xi32> to vector<1x128xi32>
      %54 = vector.shape_cast %51 : vector<1x128xi32> to vector<1x1x1x128xi32>
      tpu.vector_store %arg4[%c0_34, %c2_35, %c0_36, %c0_37], %54 {strides = array<i32>} : memref<1x3x1x128xi32, #tpu.memory_space<vmem>>, vector<1x1x1x128xi32>,
    } else {
    }
    %c4_i32_11 = arith.constant 4 : i32
    %24 = arith.addi %19, %c4_i32_11 : i32
    %c4_i32_12 = arith.constant 4 : i32
    %25 = arith.cmpi sgt, %24, %c4_i32_12 : i32
    %26 = arith.extui %25 : i1 to i32
    %c0_i32_13 = arith.constant 0 : i32
    %27 = arith.cmpi ne, %26, %c0_i32_13 : i32
    scf.if %27 {
      %28 = tpu.iota {dimensions = array<i32: 0>} : vector<4x128xi32>
      %29 = vector.broadcast %19 : i32 to vector<4x128xi32>
      %30 = arith.addi %29, %28 : vector<4x128xi32>
      %c4_i32_14 = arith.constant 4 : i32
      %31 = vector.broadcast %c4_i32_14 : i32 to vector<4x128xi32>
      %32 = arith.cmpi slt, %30, %31 : vector<4x128xi32>
      %33 = arith.andi %16, %32 : vector<4x128xi1>
      %34 = arith.andi %9, %32 : vector<4x128xi1>
      %35 = arith.andi %14, %32 : vector<4x128xi1>
      %c0_15 = arith.constant 0 : index
      %c0_16 = arith.constant 0 : index
      %c0_17 = arith.constant 0 : index
      %c0_18 = arith.constant 0 : index
      %36 = vector.load %arg4[%c0_15, %c0_16, %c0_17, %c0_18] : memref<1x3x1x128xi32, #tpu.memory_space<vmem>>, vector<1x1x1x128xi32>
      %37 = vector.shape_cast %36 : vector<1x1x1x128xi32> to vector<1x128xi32>
      %38 = arith.extui %33 : vector<4x128xi1> to vector<4x128xi32>
      %cst = arith.constant dense<0> : vector<128xi32>
      %39 = vector.multi_reduction <add>, %38, %cst [0] : vector<4x128xi32> to vector<128xi32>
      %40 = vector.shape_cast %39 : vector<128xi32> to vector<1x128xi32>
      %41 = arith.addi %37, %40 : vector<1x128xi32>
      %c0_19 = arith.constant 0 : index
      %c0_20 = arith.constant 0 : index
      %c0_21 = arith.constant 0 : index
      %c0_22 = arith.constant 0 : index
      %42 = vector.load %arg4[%c0_19, %c0_20, %c0_21, %c0_22] : memref<1x3x1x128xi32, #tpu.memory_space<vmem>>, vector<1x1x1x128xi32>
      %43 = vector.shape_cast %42 : vector<1x1x1x128xi32> to vector<1x128xi32>
      %44 = vector.shape_cast %41 : vector<1x128xi32> to vector<1x1x1x128xi32>
      tpu.vector_store %arg4[%c0_19, %c0_20, %c0_21, %c0_22], %44 {strides = array<i32>} : memref<1x3x1x128xi32, #tpu.memory_space<vmem>>, vector<1x1x1x128xi32>,
      %c0_23 = arith.constant 0 : index
      %c1 = arith.constant 1 : index
      %c0_24 = arith.constant 0 : index
      %c0_25 = arith.constant 0 : index
      %45 = vector.load %arg4[%c0_23, %c1, %c0_24, %c0_25] : memref<1x3x1x128xi32, #tpu.memory_space<vmem>>, vector<1x1x1x128xi32>
      %46 = vector.shape_cast %45 : vector<1x1x1x128xi32> to vector<1x128xi32>
      %47 = arith.extui %34 : vector<4x128xi1> to vector<4x128xi32>
      %cst_26 = arith.constant dense<0> : vector<128xi32>
      %48 = vector.multi_reduction <add>, %47, %cst_26 [0] : vector<4x128xi32> to vector<128xi32>
      %49 = vector.shape_cast %48 : vector<128xi32> to vector<1x128xi32>
      %50 = arith.addi %46, %49 : vector<1x128xi32>
      %c0_27 = arith.constant 0 : index
      %c1_28 = arith.constant 1 : index
      %c0_29 = arith.constant 0 : index
      %c0_30 = arith.constant 0 : index
      %51 = vector.load %arg4[%c0_27, %c1_28, %c0_29, %c0_30] : memref<1x3x1x128xi32, #tpu.memory_space<vmem>>, vector<1x1x1x128xi32>
      %52 = vector.shape_cast %51 : vector<1x1x1x128xi32> to vector<1x128xi32>
      %53 = vector.shape_cast %50 : vector<1x128xi32> to vector<1x1x1x128xi32>
      tpu.vector_store %arg4[%c0_27, %c1_28, %c0_29, %c0_30], %53 {strides = array<i32>} : memref<1x3x1x128xi32, #tpu.memory_space<vmem>>, vector<1x1x1x128xi32>,
      %c0_31 = arith.constant 0 : index
      %c2 = arith.constant 2 : index
      %c0_32 = arith.constant 0 : index
      %c0_33 = arith.constant 0 : index
      %54 = vector.load %arg4[%c0_31, %c2, %c0_32, %c0_33] : memref<1x3x1x128xi32, #tpu.memory_space<vmem>>, vector<1x1x1x128xi32>
      %55 = vector.shape_cast %54 : vector<1x1x1x128xi32> to vector<1x128xi32>
      %56 = arith.extui %35 : vector<4x128xi1> to vector<4x128xi32>
      %cst_34 = arith.constant dense<0> : vector<128xi32>
      %57 = vector.multi_reduction <add>, %56, %cst_34 [0] : vector<4x128xi32> to vector<128xi32>
      %58 = vector.shape_cast %57 : vector<128xi32> to vector<1x128xi32>
      %59 = arith.addi %55, %58 : vector<1x128xi32>
      %c0_35 = arith.constant 0 : index
      %c2_36 = arith.constant 2 : index
      %c0_37 = arith.constant 0 : index
      %c0_38 = arith.constant 0 : index
      %60 = vector.load %arg4[%c0_35, %c2_36, %c0_37, %c0_38] : memref<1x3x1x128xi32, #tpu.memory_space<vmem>>, vector<1x1x1x128xi32>
      %61 = vector.shape_cast %60 : vector<1x1x1x128xi32> to vector<1x128xi32>
      %62 = vector.shape_cast %59 : vector<1x128xi32> to vector<1x1x1x128xi32>
      tpu.vector_store %arg4[%c0_35, %c2_36, %c0_37, %c0_38], %62 {strides = array<i32>} : memref<1x3x1x128xi32, #tpu.memory_space<vmem>>, vector<1x1x1x128xi32>,
    } else {
    }
    return
  }
  func.func @transform_0(%arg0: i32, %arg1: i32) -> (i32, i32) {
    %c1_i32 = arith.constant 1 : i32
    %0 = arith.muli %arg0, %c1_i32 : i32
    %1 = arith.addi %0, %arg1 : i32
    %c0_i32 = arith.constant 0 : i32
    %2 = arith.minsi %1, %c0_i32 : i32
    %c0_i32_0 = arith.constant 0 : i32
    %c0_i32_1 = arith.constant 0 : i32
    return %2, %c0_i32_0 : i32, i32
  }
  func.func @transform_1(%arg0: i32, %arg1: i32) -> (i32, i32) {
    %c1_i32 = arith.constant 1 : i32
    %0 = arith.muli %arg0, %c1_i32 : i32
    %1 = arith.addi %0, %arg1 : i32
    %c0_i32 = arith.constant 0 : i32
    %2 = arith.minsi %1, %c0_i32 : i32
    %c0_i32_0 = arith.constant 0 : i32
    %c0_i32_1 = arith.constant 0 : i32
    return %2, %c0_i32_0 : i32, i32
  }
  func.func @transform_2(%arg0: i32, %arg1: i32) -> (i32, i32, i32, i32) {
    %c0_i32 = arith.constant 0 : i32
    %c0_i32_0 = arith.constant 0 : i32
    %c0_i32_1 = arith.constant 0 : i32
    %c0_i32_2 = arith.constant 0 : i32
    return %arg0, %c0_i32, %c0_i32_0, %c0_i32_1 : i32, i32, i32, i32
  }
}

</mosaic_0001>

<bundles_post_ra>
// kernel: jaccard_index_pallas.1
= control target key start
LH: loop header
LB: loop body
LE: loop exit
PB: predicated region body
PF: predicated region fallthrough
CT: control target
= control target key end

     0   :  { %7 = vsyncpa [#allocation3], 0  ;;  %s317_s0 = inlined_call_operand.hbm [shape: s32[4,128], index: 0, kind: input, shape index: {}]   ;;  %s318_s1 = inlined_call_operand.hbm [shape: s32[4,128], index: 1, kind: input, shape index: {}]   ;;  %s319_s2 = inlined_call_operand.hbm [shape: s32[1,3,1,128], index: 2, kind: output, shape index: {}]  }
   0x1   :  { %8 = vsyncpa [#allocation6], 0 }
   0x2   :  { %9 = vsyncpa [#allocation4], 0  ;;  %s260_s9 = smov [#allocation2]   ;;  %s261_s11 = smov [#allocation5]  }
   0x3   :  { %s21_s10 = sshll.u32 %s260_s9, 4  ;;  %s36_s12 = sshll.u32 %s261_s11, 4  ;;  %s22_s10 = int_to_ptr.vmem [resolvable:$true] %s21_s10  ;;  %s37_s12 = int_to_ptr.vmem [resolvable:$true] %s36_s12 }
   0x4   :  { %s188_s15 = scalar_lea.hbm %s317_s0, 64 }
   0x5   :  { %p189_p0 = scmp.ne.s32.totalorder %s317_s0, %s188_s15  ;;  %p192_p1 = scmp.lt.u32.totalorder %s188_s15, %s317_s0 }
   0x7   :  { %p194_p2 = pnand %p192_p1, %p189_p0 }
   0x9   :  { %197 = shalt.err (!%p194_p2)
}
   0xa   :  { %s198_s20 = scalar_lea.vmem %s22_s10, 64  ;;  %p203_p4 = scmp.lt.s32.totalorder %s22_s10, %s22_s10 }
   0xb   :  { %p199_p3 = scmp.ne.s32.totalorder %s22_s10, %s198_s20  ;;  %p204_p5 = scmp.lt.s32.totalorder %s198_s20, %s198_s20 }
   0xd   :  { %p205_p6 = por %p204_p5, %p203_p4 }
   0xf   :  { %p206_p7 = pnand %p205_p6, %p199_p3 }
  0x11   :  { %209 = shalt.err (!%p206_p7)
}
  0x12   :  { %24 = dma.hbm_to_vmem [thread:$0]  %s317_s0, 64, %s22_s10, [#allocation3]  }
  0x13   :  { %s210_s25 = scalar_lea.hbm %s318_s1, 64 }
  0x14   :  { %p211_p8 = scmp.ne.s32.totalorder %s318_s1, %s210_s25  ;;  %p214_p9 = scmp.lt.u32.totalorder %s210_s25, %s318_s1 }
  0x16   :  { %p216_p10 = pnand %p214_p9, %p211_p8 }
  0x18   :  { %219 = shalt.err (!%p216_p10)
}
  0x19   :  { %s220_s30 = scalar_lea.vmem %s37_s12, 64  ;;  %p225_p12 = scmp.lt.s32.totalorder %s37_s12, %s37_s12 }
  0x1a   :  { %p221_p11 = scmp.ne.s32.totalorder %s37_s12, %s220_s30  ;;  %p226_p13 = scmp.lt.s32.totalorder %s220_s30, %s220_s30 }
  0x1c   :  { %p227_p0 = por %p226_p13, %p225_p12 }
  0x1e   :  { %p228_p1 = pnand %p227_p0, %p221_p11 }
  0x20   :  { %231 = shalt.err (!%p228_p1)
}
  0x21   :  { %39 = dma.hbm_to_vmem [thread:$0]  %s318_s1, 64, %s37_s12, [#allocation6]  }
  0x22   :  { %254 = dma.done.wait [#allocation3], 64  }
  0x23   :  { %255 = vsyncadd [#allocation3], 4294967232 }
  0x24   :  { %256 = dma.done.wait [#allocation6], 64  }
  0x25   :  { %257 = vsyncadd [#allocation6], 4294967232  ;;  %v262_v0 = vmov 0   ;;  %v59_v1 = vld [vmem:[#allocation2] sm:$0xf]  ;;  %vm78_vm3 = vcmask 1043456  }
  0x26   :  { %56 = vst [vmem:[#allocation7] sm:$0x1] %v262_v0  ;;  %57 = vst [vmem:[#allocation7 + $0x1] sm:$0x1] %v262_v0  ;;  %v60_v2 = vld [vmem:[#allocation5] sm:$0xf] }
  0x27   :  { %58 = vst [vmem:[#allocation7 + $0x2] sm:$0x1] %v262_v0  ;;  %vm61_vm0 = vcmp.ge.s32.totalorder %v60_v2, 0  ;;  %vm62_vm1 = vcmp.le.s32.totalorder %v60_v2, 1  ;;  %vm67_vm2 = vcmp.eq.s32.totalorder %v60_v2, %v59_v1  ;;  %vm64_vm5 = vcmp.ge.s32.totalorder %v59_v1, 0  ;;  %s263_s1 = smov [#allocation7]  }
  0x28   :  { %vm63_vm4 = vmand %vm61_vm0, %vm62_vm1  ;;  %vm65_vm6 = vcmp.le.s32.totalorder %v59_v1, 1  ;;  %s165_s4 = sshll.u32 %s263_s1, 4  ;;  %s166_s4 = int_to_ptr.vmem [resolvable:$true] %s165_s4 }
  0x29   :  { %vm68_vm7 = vmand %vm67_vm2, %vm63_vm4  ;;  %v90_v3 = vsel %vm63_vm4, 1, %v262_v0  ;;  %s232_s5 = scalar_lea.vmem %s166_s4, 48  ;;  %s236_s6 = scalar_lea.vmem %s166_s4, 64 }
  0x2a   :  { %v77_v4 = vsel %vm68_vm7, 1, %v262_v0  ;;  %v91_v5 = vsel %vm78_vm3, %v90_v3, 0  ;;  %vm66_vm8 = vmand %vm64_vm5, %vm65_vm6  ;;  %p233_p2 = scmp.ne.s32.totalorder %s166_s4, %s232_s5  ;;  %p237_p3 = scmp.lt.s32.totalorder %s166_s4, %s166_s4 }
  0x2b   :  { %v79_v6 = vsel %vm78_vm3, %v77_v4, 0  ;;  %v92_v7 = vrot.slane %v91_v5, 4  ;;  %v102_v8 = vsel %vm66_vm8, 1, %v262_v0  ;;  %p238_p4 = scmp.lt.s32.totalorder %s236_s6, %s232_s5 }
  0x2c   :  { %v80_v9 = vrot.slane %v79_v6, 4  ;;  %v103_v10 = vsel %vm78_vm3, %v102_v8, 0 }
  0x2d   :  { %v93_v11 = vadd.s32 %v92_v7, %v91_v5  ;;  %v104_v12 = vrot.slane %v103_v10, 4  ;;  %v89_v23 = vld [vmem:[#allocation7 + $0x1] sm:$0x1]  ;;  %v76_v24 = vld [vmem:[#allocation7] sm:$0x1]  ;;  %p239_p5 = por %p238_p4, %p237_p3 }
  0x2e   :  { %v81_v13 = vadd.s32 %v80_v9, %v79_v6  ;;  %v101_v28 = vld [vmem:[#allocation7 + $0x2] sm:$0x1] }
  0x2f   :  { %v94_v14 = vrot.slane %v93_v11, 2  ;;  %v105_v15 = vadd.s32 %v104_v12, %v103_v10  ;;  %p240_p6 = pnand %p239_p5, %p233_p2 }
  0x30   :  { %v82_v16 = vrot.slane %v81_v13, 2 }
  0x31   :  { %v95_v17 = vadd.s32 %v94_v14, %v93_v11  ;;  %v106_v18 = vrot.slane %v105_v15, 2 }
  0x32   :  { %v83_v19 = vadd.s32 %v82_v16, %v81_v13 }
  0x33   :  { %v96_v20 = vrot.slane %v95_v17, 1  ;;  %v107_v21 = vadd.s32 %v106_v18, %v105_v15 }
  0x34   :  { %v84_v22 = vrot.slane %v83_v19, 1 }
  0x35   :  { %v97_v25 = vadd.s32 %v96_v20, %v95_v17  ;;  %v108_v26 = vrot.slane %v107_v21, 1 }
  0x36   :  { %v85_v27 = vadd.s32 %v84_v22, %v83_v19 }
  0x37   :  { %v98_v29 = vadd.s32 %v97_v25, %v89_v23  ;;  %v109_v30 = vadd.s32 %v108_v26, %v107_v21 }
  0x38   :  { %v86_v31 = vadd.s32 %v85_v27, %v76_v24 }
  0x39   :  { %99 = vst [vmem:[#allocation7 + $0x1] sm:$0x1] %v98_v29  ;;  %v110_v32 = vadd.s32 %v109_v30, %v101_v28 }
  0x3a   :  { %87 = vst [vmem:[#allocation7] sm:$0x1] %v86_v31 }
  0x3b   :  { %111 = vst [vmem:[#allocation7 + $0x2] sm:$0x1] %v110_v32 }
  0x3c   :  { %243 = shalt.err (!%p240_p6)
}
  0x3d   :  { %s244_s9 = scalar_lea.hbm %s319_s2, 48 }
  0x3e   :  { %p245_p7 = scmp.ne.s32.totalorder %s319_s2, %s244_s9  ;;  %p248_p8 = scmp.lt.u32.totalorder %s244_s9, %s319_s2 }
  0x40   :  { %p250_p9 = pnand %p248_p8, %p245_p7 }
  0x42   :  { %253 = shalt.err (!%p250_p9)
}
  0x43   :  { %s264_s14 = smov 16   ;;  %s265_s15 = smov 1  }
  0x44   :  { %171 = dma.vmem_to_hbm [thread:$0]  %s166_s4, 48, %s319_s2, [#allocation4], %s264_s14, %s264_s14, %s265_s15  }
  0x45   :  { %258 = dma.done.wait [#allocation4], 48  }
  0x46   :  { %259 = vsyncadd [#allocation4], 4294967248 }
  0x47   :  { %175 = vsyncpa [#allocation3], 1 }
  0x48   :  { %176 = vsyncpa [#allocation6], 1 }
  0x49   :  { %177 = vsyncpa [#allocation4], 1 }

</bundles_post_ra>
